<compile_context>
chip_gen: v7x
topology: tpu7x:2x2x1
jax: 0.10.0
libtpu: 0.0.40
codegen_flags: <defaults>
</compile_context>

<pallas_src>
import functools

import jax
import jax.numpy as jnp
import numpy as np
from jax.experimental import pallas as pl
from jax.experimental.pallas import tpu as pltpu


def _round_up(n, m):
    return ((n + m - 1) // m) * m


def _cdiv(a, b):
    return (a + b - 1) // b


# ---------------------------------------------------------------------------
# Pass 1: per-(b,c) mean over the fused spatial axis (AdaptiveAvgPool3d(1)).
# acc_ref is an (rt, 128) VMEM scratch of lane-group partial sums; the single
# cross-lane reduce + 1/S scale happen once per row block in the finalize.
# ---------------------------------------------------------------------------
def mean_kernel(x_ref, mean_ref, acc_ref, *, inv_s, s_true, mask_edge):
    s = pl.program_id(1)

    @pl.when(s == 0)
    def _init():
        acc_ref[...] = jnp.zeros_like(acc_ref)

    xb = x_ref[...].astype(jnp.float32)            # (rt, ts)
    ts = xb.shape[1]
    if mask_edge:
        # Ragged last S tile: zero out lanes past the true spatial extent so
        # unspecified out-of-bounds block contents never enter the sum.
        lane = jax.lax.broadcasted_iota(jnp.int32, xb.shape, 1)
        xb = jnp.where(s * ts + lane < s_true, xb, 0.0)

    # Fold the ts/128 lane groups with VALU adds (no per-step XLU reduce tree).
    part = xb[:, 0:128]
    for g in range(1, ts // 128):
        part = part + xb[:, g * 128:(g + 1) * 128]
    acc_ref[...] += part

    @pl.when(s == pl.num_programs(1) - 1)
    def _finalize():
        mean_ref[...] = jnp.sum(acc_ref[...], axis=1, keepdims=True) * inv_s


# ---------------------------------------------------------------------------
# Pass 2: out = x * sigmoid(x * scale)   (fully tiled elementwise stream).
# No masking needed: out-of-bounds regions of edge output blocks are dropped.
# ---------------------------------------------------------------------------
def apply_kernel(x_ref, scale_ref, o_ref):
    xb = x_ref[...].astype(jnp.float32)            # (rt, ts)
    t = xb * scale_ref[...]                        # (rt, 1) broadcast over lanes
    sig = 1.0 / (1.0 + jnp.exp(-t))                # exact sigmoid (torch parity)
    o_ref[...] = (xb * sig).astype(o_ref.dtype)


def imda_forward(x, conv_w, *, lane_tile=2048, row_tile=256):
    """x: (B, C, D, H, W); conv_w: Conv1d(1,1,3,bias=False) weight (3 taps)."""
    B, C, D, H, W = x.shape
    S = D * H * W
    R = B * C
    dtype = x.dtype

    # Lane tile: multiple of 128, capped near the (rounded-up) spatial extent.
    lane_tile = _round_up(max(lane_tile, 128), 128)
    ts = min(lane_tile, _round_up(S, 128))
    # Row tile: multiple of 8; when everything fits one tile, split so the
    # "parallel" row axis still has >= 2 blocks (keeps v7x's 2nd TC busy).
    if R > row_tile:
        rt = _round_up(row_tile, 8)
    else:
        rt = max(8, _round_up(_cdiv(R, 2), 8))

    n_r = _cdiv(R, rt)
    n_s = _cdiv(S, ts)
    mask_edge = (S % ts) != 0

    x2 = x.reshape(R, S)
    vmem_bytes = 48 * 1024 * 1024    # <= v7x 64 MiB physical, fine on v5e/v6e

    # ---- pass 1: per-(b, c) mean -------------------------------------------
    mean_rows = pl.pallas_call(
        functools.partial(mean_kernel, inv_s=1.0 / float(S), s_true=S,
                          mask_edge=mask_edge),
        out_shape=jax.ShapeDtypeStruct((R, 1), jnp.float32),
        grid_spec=pltpu.PrefetchScalarGridSpec(
            num_scalar_prefetch=0,
            grid=(n_r, n_s),                       # reduction axis (S) last
            in_specs=[pl.BlockSpec((rt, ts), lambda r, s: (r, s))],
            out_specs=pl.BlockSpec((rt, 1), lambda r, s: (r, 0)),
            scratch_shapes=[pltpu.VMEM((rt, 128), jnp.float32)],
        ),
        compiler_params=pltpu.CompilerParams(
            dimension_semantics=("parallel", "arbitrary"),
            vmem_limit_bytes=vmem_bytes,
        ),
    )(x2)

    # ---- tiny channel conv (k=3, pad=1, no bias) + sigmoid: plain jnp -------
    # Only B*C elements; XLA fuses this — no extra Pallas launch / HBM traffic.
    w = conv_w.astype(jnp.float32).reshape(-1)
    mp = jnp.pad(mean_rows.reshape(B, C), ((0, 0), (1, 1)))
    z = w[0] * mp[:, :-2] + w[1] * mp[:, 1:-1] + w[2] * mp[:, 2:]
    scale_rows = jax.nn.sigmoid(z).reshape(R, 1)

    # ---- pass 2: elementwise apply ------------------------------------------
    out2 = pl.pallas_call(
        apply_kernel,
        out_shape=jax.ShapeDtypeStruct((R, S), dtype),
        grid_spec=pltpu.PrefetchScalarGridSpec(
            num_scalar_prefetch=0,
            grid=(n_r, n_s),
            in_specs=[
                pl.BlockSpec((rt, ts), lambda r, s: (r, s)),
                pl.BlockSpec((rt, 1), lambda r, s: (r, 0)),
            ],
            out_specs=pl.BlockSpec((rt, ts), lambda r, s: (r, s)),
        ),
        compiler_params=pltpu.CompilerParams(
            dimension_semantics=("parallel", "parallel"),
            vmem_limit_bytes=vmem_bytes,
        ),
    )(x2, scale_rows)

    return out2.reshape(B, C, D, H, W)


def imda_reference(x, conv_w):
    # Pure-JAX reproduction of IMDA_module.forward (dead SIMAM branch omitted).
    w = conv_w.reshape(-1)
    m = x.mean(axis=(2, 3, 4))                                   # (B, C)
    mp = jnp.pad(m, ((0, 0), (1, 1)))
    z = w[0] * mp[:, :-2] + w[1] * mp[:, 1:-1] + w[2] * mp[:, 2:]
    scale = jax.nn.sigmoid(z)[:, :, None, None, None]
    return x * jax.nn.sigmoid(x * scale)


if __name__ == "__main__":
    key = jax.random.PRNGKey(0)
    kx1, kx2, kw = jax.random.split(key, 3)

    # Deterministic Conv1d(1, 1, 3, bias=False) weight (synthetic init).
    conv_w = jax.random.normal(kw, (3,), dtype=jnp.float32) * (1.0 / jnp.sqrt(3.0))

    # Case 1: ragged shapes (R = B*C = 10 rows, S = 300 lanes) with small lane
    # tiles so the multi-tile accumulation + edge-mask + partial-row paths run.
    x1 = jax.random.normal(kx1, (2, 5, 3, 10, 10), dtype=jnp.float32)
    fwd1 = jax.jit(functools.partial(imda_forward, lane_tile=128, row_tile=256))
    out1 = jax.block_until_ready(fwd1(x1, conv_w))
    np.testing.assert_allclose(np.asarray(out1),
                               np.asarray(imda_reference(x1, conv_w)),
                               rtol=1e-3, atol=1e-3)

    # Case 2: tile-aligned shapes (R = 8, S = 1024), two 512-lane tiles.
    x2 = jax.random.normal(kx2, (2, 4, 4, 16, 16), dtype=jnp.float32)
    fwd2 = jax.jit(functools.partial(imda_forward, lane_tile=512))
    out2 = jax.block_until_ready(fwd2(x2, conv_w))
    np.testing.assert_allclose(np.asarray(out2),
                               np.asarray(imda_reference(x2, conv_w)),
                               rtol=1e-3, atol=1e-3)

    print("KERNEL_OK")
</pallas_src>

<mosaic_0001>
module attributes {stable_mosaic.version = 11 : i64} {
  func.func @mean_kernel(%arg0: i32, %arg1: i32, %arg2: memref<8x128xf32, #tpu.memory_space<vmem>>, %arg3: memref<8x1xf32, #tpu.memory_space<vmem>>, %arg4: memref<8x128xf32, #tpu.memory_space<vmem>>) attributes {dimension_semantics = [#tpu.dimension_semantics<parallel>, #tpu.dimension_semantics<arbitrary>], iteration_bounds = array<i64: 2, 3>, scalar_prefetch = 0 : i64, scratch_operands = 1 : i64, tpu.core_type = #tpu.core_type<tc>, window_params = [{transform_indices = @transform_0, window_bounds = array<i64: 8, 128>}, {transform_indices = @transform_1, window_bounds = array<i64: 8, 1>}]} {
    %c0_i32 = arith.constant 0 : i32
    %0 = arith.cmpi eq, %arg1, %c0_i32 : i32
    %1 = arith.extui %0 : i1 to i32
    %c0_i32_0 = arith.constant 0 : i32
    %2 = arith.cmpi ne, %1, %c0_i32_0 : i32
    scf.if %2 {
      %cst_7 = arith.constant 0.000000e+00 : f32
      %18 = vector.broadcast %cst_7 : f32 to vector<8x128xf32>
      %c0_8 = arith.constant 0 : index
      %c0_9 = arith.constant 0 : index
      %19 = vector.load %arg4[%c0_8, %c0_9] : memref<8x128xf32, #tpu.memory_space<vmem>>, vector<8x128xf32>
      tpu.vector_store %arg4[%c0_8, %c0_9], %18 {strides = array<i32>} : memref<8x128xf32, #tpu.memory_space<vmem>>, vector<8x128xf32>,
    } else {
    }
    %c0 = arith.constant 0 : index
    %c0_1 = arith.constant 0 : index
    %3 = vector.load %arg2[%c0, %c0_1] : memref<8x128xf32, #tpu.memory_space<vmem>>, vector<8x128xf32>
    %4 = tpu.iota {dimensions = array<i32: 1>} : vector<8x128xi32>
    %c128_i32 = arith.constant 128 : i32
    %5 = arith.muli %arg1, %c128_i32 : i32
    %6 = vector.broadcast %5 : i32 to vector<8x128xi32>
    %7 = arith.addi %6, %4 : vector<8x128xi32>
    %c300_i32 = arith.constant 300 : i32
    %8 = vector.broadcast %c300_i32 : i32 to vector<8x128xi32>
    %9 = arith.cmpi slt, %7, %8 : vector<8x128xi32>
    %cst = arith.constant 0.000000e+00 : f32
    %10 = vector.broadcast %cst : f32 to vector<8x128xf32>
    %11 = arith.select %9, %3, %10 : vector<8x128xi1>, vector<8x128xf32>
    %c0_2 = arith.constant 0 : index
    %c0_3 = arith.constant 0 : index
    %12 = vector.load %arg4[%c0_2, %c0_3] : memref<8x128xf32, #tpu.memory_space<vmem>>, vector<8x128xf32>
    %13 = arith.addf %12, %11 : vector<8x128xf32>
    %c0_4 = arith.constant 0 : index
    %c0_5 = arith.constant 0 : index
    %14 = vector.load %arg4[%c0_4, %c0_5] : memref<8x128xf32, #tpu.memory_space<vmem>>, vector<8x128xf32>
    tpu.vector_store %arg4[%c0_4, %c0_5], %13 {strides = array<i32>} : memref<8x128xf32, #tpu.memory_space<vmem>>, vector<8x128xf32>,
    %c2_i32 = arith.constant 2 : i32
    %15 = arith.cmpi eq, %arg1, %c2_i32 : i32
    %16 = arith.extui %15 : i1 to i32
    %c0_i32_6 = arith.constant 0 : i32
    %17 = arith.cmpi ne, %16, %c0_i32_6 : i32
    scf.if %17 {
      %c0_7 = arith.constant 0 : index
      %c0_8 = arith.constant 0 : index
      %18 = vector.load %arg4[%c0_7, %c0_8] : memref<8x128xf32, #tpu.memory_space<vmem>>, vector<8x128xf32>
      %cst_9 = arith.constant dense<0.000000e+00> : vector<8xf32>
      %19 = vector.multi_reduction <add>, %18, %cst_9 [1] : vector<8x128xf32> to vector<8xf32>
      %20 = vector.shape_cast %19 : vector<8xf32> to vector<8x1xf32>
      %cst_10 = arith.constant 0.00333333341 : f32
      %21 = vector.broadcast %cst_10 : f32 to vector<8x1xf32>
      %22 = arith.mulf %20, %21 : vector<8x1xf32>
      %c0_11 = arith.constant 0 : index
      %c0_12 = arith.constant 0 : index
      %23 = vector.load %arg3[%c0_11, %c0_12] : memref<8x1xf32, #tpu.memory_space<vmem>>, vector<8x1xf32>
      tpu.vector_store %arg3[%c0_11, %c0_12], %22 {strides = array<i32>} : memref<8x1xf32, #tpu.memory_space<vmem>>, vector<8x1xf32>,
    } else {
    }
    return
  }
  func.func @transform_0(%arg0: i32, %arg1: i32) -> (i32, i32) {
    %c0_i32 = arith.constant 0 : i32
    return %arg0, %arg1 : i32, i32
  }
  func.func @transform_1(%arg0: i32, %arg1: i32) -> (i32, i32) {
    %c0_i32 = arith.constant 0 : i32
    %c0_i32_0 = arith.constant 0 : i32
    return %arg0, %c0_i32 : i32, i32
  }
}

module attributes {stable_mosaic.version = 11 : i64} {
  func.func @apply_kernel(%arg0: i32, %arg1: i32, %arg2: memref<8x128xf32, #tpu.memory_space<vmem>>, %arg3: memref<8x1xf32, #tpu.memory_space<vmem>>, %arg4: memref<8x128xf32, #tpu.memory_space<vmem>>) attributes {dimension_semantics = [#tpu.dimension_semantics<parallel>, #tpu.dimension_semantics<parallel>], iteration_bounds = array<i64: 2, 3>, scalar_prefetch = 0 : i64, scratch_operands = 0 : i64, tpu.core_type = #tpu.core_type<tc>, window_params = [{transform_indices = @transform_0, window_bounds = array<i64: 8, 128>}, {transform_indices = @transform_1, window_bounds = array<i64: 8, 1>}, {transform_indices = @transform_2, window_bounds = array<i64: 8, 128>}]} {
    %c0 = arith.constant 0 : index
    %c0_0 = arith.constant 0 : index
    %0 = vector.load %arg2[%c0, %c0_0] : memref<8x128xf32, #tpu.memory_space<vmem>>, vector<8x128xf32>
    %c0_1 = arith.constant 0 : index
    %c0_2 = arith.constant 0 : index
    %1 = vector.load %arg3[%c0_1, %c0_2] : memref<8x1xf32, #tpu.memory_space<vmem>>, vector<8x1xf32>
    %2 = vector.broadcast %1 : vector<8x1xf32> to vector<8x128xf32>
    %3 = arith.mulf %0, %2 : vector<8x128xf32>
    %cst = arith.constant 0.000000e+00 : f32
    %4 = vector.broadcast %cst : f32 to vector<8x128xf32>
    %5 = arith.subf %4, %3 : vector<8x128xf32>
    %6 = math.exp %5 : vector<8x128xf32>
    %cst_3 = arith.constant 1.000000e+00 : f32
    %7 = vector.broadcast %cst_3 : f32 to vector<8x128xf32>
    %8 = arith.addf %7, %6 : vector<8x128xf32>
    %cst_4 = arith.constant 1.000000e+00 : f32
    %9 = vector.broadcast %cst_4 : f32 to vector<8x128xf32>
    %10 = arith.divf %9, %8 : vector<8x128xf32>
    %11 = arith.mulf %0, %10 : vector<8x128xf32>
    %c0_5 = arith.constant 0 : index
    %c0_6 = arith.constant 0 : index
    %12 = vector.load %arg4[%c0_5, %c0_6] : memref<8x128xf32, #tpu.memory_space<vmem>>, vector<8x128xf32>
    tpu.vector_store %arg4[%c0_5, %c0_6], %11 {strides = array<i32>} : memref<8x128xf32, #tpu.memory_space<vmem>>, vector<8x128xf32>,
    return
  }
  func.func @transform_0(%arg0: i32, %arg1: i32) -> (i32, i32) {
    %c0_i32 = arith.constant 0 : i32
    return %arg0, %arg1 : i32, i32
  }
  func.func @transform_1(%arg0: i32, %arg1: i32) -> (i32, i32) {
    %c0_i32 = arith.constant 0 : i32
    %c0_i32_0 = arith.constant 0 : i32
    return %arg0, %c0_i32 : i32, i32
  }
  func.func @transform_2(%arg0: i32, %arg1: i32) -> (i32, i32) {
    %c0_i32 = arith.constant 0 : i32
    return %arg0, %arg1 : i32, i32
  }
}

</mosaic_0001>

<bundles_post_ra>
// kernel: imda_forward.2
= control target key start
LH: loop header
LB: loop body
LE: loop exit
PB: predicated region body
PF: predicated region fallthrough
CT: control target
= control target key end

     0   :  { %s339_s6 = smov 0   ;;  %s341_s7 = smov 0   ;;  %s397_s0 = inlined_call_operand.vmem [shape: f32[10,300], index: 0, kind: input, shape index: {}]   ;;  %s398_s1 = inlined_call_operand.vmem [shape: f32[10,1], index: 1, kind: output, shape index: {}]  }
   0x1   :  { %s343_s8 = smov 0   ;;  %s345_s9 = smov 0  }
   0x2   :  { %s347_s10 = smov 0  }
   0x3 LB: > { %s20_s11 = sadd.s32 1, %s318_s8  ;;  %s23_s12 = sadd.s32 1, %s322_s9  ;;  %s326_s10 = sphi %s347_s10, %s11_s10   ;;  %s322_s9 = sphi %s345_s9, %s402_s9   ;;  %s318_s8 = sphi %s343_s8, %s401_s8   ;;  %s314_s7 = sphi %s341_s7, %s400_s7   ;;  %s310_s6 = sphi %s339_s6, %s399_s6  }
   0x4   : > { %p21_p0 = scmp.ge.s32.totalorder %s20_s11, 3  ;;  %p238_p1 = scmp.ge.s32.totalorder %s326_s10, 1 }
   0x5   : > { %p104_p2 = scmp.lt.s32.totalorder %s326_s10, 7 }
   0x6   : > { %s404_s11 = smov (%p21_p0, %s20_s11), 0  ;;  %s406_s12 = smov (!%p21_p0, %s23_s12), %s322_s9 }
   0x7   : > { %p105_p3 = pnand %p238_p1, %p104_p2  ;;  %p25_p4 = scmp.ge.s32.totalorder %s406_s12, 2 }
   0x8   : > { %p126_p5 = scmp.lt.s32.totalorder (!%p105_p3), %s314_s7, 1  ;;  %p128_p6 = scmp.lt.s32.totalorder (!%p105_p3), %s310_s6, 2 }
   0x9   : > { %s408_s12 = smov (%p25_p4, %s406_s12), 0  ;;  %108 = sbr.rel (%p105_p3) target bundleno = 186 (0xba), region = 24 }
   0xa   : > { %p241_p7 = scmp.ne.s32.totalorder (!%p105_p3), %s310_s6, 0 }
  0x10   : > { %s410_s7 = smov (!%p126_p5, %s314_s7), 1  ;;  %141 = sbr.rel (%p241_p7) target bundleno = 23 (0x17), region = 28 }
  0x11   : > { %s129_s13 = scalar_select %p128_p6, %s310_s6, 2 }
  0x12   : > { %s246_s14 = smul.u32 3, %s410_s7  ;;  %s240_s15 = sshll.u32 %s410_s7, 3  ;;  %v328_v0 = vmov (!%p241_p7), 0.0  }
  0x13   : > { %s137_s18 = scalar_lea.vmem %s398_s1, %s240_s15  ;;  %142 = vst [vmem:[#allocation2] sm:$0xff] (!%p241_p7), %v328_v0 }
  0x14   : > { %s131_s19 = sadd.s32 %s246_s14, %s129_s13 }
  0x15   : > { %s239_s20 = sshll.u32 %s131_s19, 3 }
  0x16   : > { %s133_s23 = scalar_lea.vmem %s397_s0, %s239_s20 }
  0x17 PF: > { %v144_v1 = vlaneseq  ;;  %s242_s24 = sshll.u32 %s310_s6, 7  ;;  %v143_v4 = vld [vmem:[%s133_s23] sm:$0xff]  ;;  %p243_p8 = scmp.ne.s32.totalorder %s310_s6, 2 }
  0x18   : > { %v147_v2 = vstv %s242_s24  ;;  %vm162_vm1 = vcmask (!%p243_p8), 7168  }
  0x19   : > { %v145_v3 = vand.u32 127, %v144_v1 }
  0x1a   : > { %v151_v6 = vld [vmem:[#allocation2] sm:$0xff] }
  0x1b   : > { %v148_v5 = vadd.s32 %v147_v2, %v145_v3  ;;  %157 = sbr.rel (%p243_p8) target bundleno = 186 (0xba), region = 32 }
  0x1d   : > { %vm149_vm0 = vcmp.lt.s32.totalorder %v148_v5, 300 }
  0x1e   : > { %v150_v7 = vsel %vm149_vm0, %v143_v4, 0.0 }
  0x1f   : > { %v152_v8 = vadd.f32 %v151_v6, %v150_v7 }
  0x21   : > { %153 = vst [vmem:[#allocation2] sm:$0xff] %v152_v8 }
  0x28   : > { %v158_v9 = vld [vmem:[#allocation2] sm:$0xff] }
  0x29   : > { %159 = vadd.xlane.f32.xlu0 %v158_v9 }
  0xb6   : > { %v160_v10 = vpop.xlane.xlu0 %159 }
  0xb7   : > { %v161_v11 = vmul.f32 0.0033333334, %v160_v10 }
  0xb9   : > { %163 = vst.msk [vmem:[%s137_s18] sm:$0xff] %vm162_vm1, %v161_v11 }
  0xba PF: > { %s11_s10 = sadd.s32 1, %s326_s10   ;;  %s399_s6 = smov %s318_s8 }
  0xbb   : > { %p8_p9 = scmp.ge.s32.totalorder %s11_s10, 8   ;;  %s400_s7 = smov %s322_s9 }
  0xbc   : > { %s401_s8 = smov %s404_s11  ;;  %s402_s9 = smov %s408_s12 }
  0xbd   :  { %10 = sbr.rel (!%p8_p9) target bundleno = 3 (0x3), region = 62 }

// kernel: imda_forward.3
= control target key start
LH: loop header
LB: loop body
LE: loop exit
PB: predicated region body
PF: predicated region fallthrough
CT: control target
= control target key end

     0   :  { %s419_s9 = smov 0   ;;  %s421_s10 = smov 0   ;;  %s473_s0 = inlined_call_operand.vmem [shape: f32[10,300], index: 0, kind: input, shape index: {}]   ;;  %s474_s1 = inlined_call_operand.vmem [shape: f32[10,1], index: 1, kind: input, shape index: {}]   ;;  %s475_s2 = inlined_call_operand.vmem [shape: f32[10,300], index: 2, kind: output, shape index: {}]  }
   0x1   :  { %s423_s11 = smov 0   ;;  %s425_s12 = smov 0  }
   0x2   :  { %s427_s13 = smov 0  }
   0x3 LB: > { %s21_s14 = sadd.s32 1, %s393_s11  ;;  %s24_s15 = sadd.s32 1, %s397_s12  ;;  %s401_s13 = sphi %s427_s13, %s12_s13   ;;  %s397_s12 = sphi %s425_s12, %s479_s12   ;;  %s393_s11 = sphi %s423_s11, %s478_s11   ;;  %s389_s10 = sphi %s421_s10, %s477_s10   ;;  %s385_s9 = sphi %s419_s9, %s476_s9  }
   0x4   : > { %p22_p0 = scmp.ge.s32.totalorder %s21_s14, 3  ;;  %p310_p1 = scmp.ge.s32.totalorder %s401_s13, 1 }
   0x5   : > { %p140_p2 = scmp.lt.s32.totalorder %s401_s13, 7 }
   0x6   : > { %s481_s14 = smov (%p22_p0, %s21_s14), 0  ;;  %s483_s15 = smov (!%p22_p0, %s24_s15), %s397_s12 }
   0x7   : > { %p141_p3 = pnand %p310_p1, %p140_p2  ;;  %p26_p4 = scmp.ge.s32.totalorder %s483_s15, 2 }
   0x8   : > { %p172_p5 = scmp.lt.s32.totalorder (!%p141_p3), %s389_s10, 1  ;;  %v403_v0 = vmov (!%p141_p3), 0   ;;  %p174_p6 = scmp.lt.s32.totalorder (!%p141_p3), %s385_s9, 2 }
   0x9   : > { %s485_s15 = smov (%p26_p4, %s483_s15), 0  ;;  %144 = sbr.rel (%p141_p3) target bundleno = 181 (0xb5), region = 28 }
   0xa   : > { %358 = vset.pattern.permute.xlu0 (!%p141_p3), %v403_v0 }
  0x10   : > { %s487_s10 = smov (!%p172_p5, %s389_s10), 1  ;;  %s489_s9 = smov (!%p174_p6, %s385_s9), 2 }
  0x11   : > { %s312_s16 = sshll.u32 %s487_s10, 3  ;;  %s316_s20 = smul.u32 3, %s487_s10 }
  0x12   : > { %s183_s19 = scalar_lea.vmem %s474_s1, %s312_s16 }
  0x13   : > { %v193_v1 = vld [vmem:[%s183_s19] sm:$0xff]  ;;  %s177_s21 = sadd.s32 %s316_s20, %s489_s9 }
  0x14   : > { %196 = vperm.xlu0 %358, %v193_v1   ;;  %s311_s22 = sshll.u32 %s177_s21, 3 }
  0x15   : > { %s179_s25 = scalar_lea.vmem %s473_s0, %s311_s22  ;;  %s191_s28 = scalar_lea.vmem %s475_s2, %s311_s22 }
  0x16   : > { %v192_v2 = vld [vmem:[%s179_s25] sm:$0xff] }
  0x93   : > { %v197_v3 = vpop.permute.xlu0 %196 }
  0x94   : > { %v199_v4 = vmul.f32 %v197_v3, %v192_v2 }
  0x96   : > { %v200_v5 = vsub.f32 0.0, %v199_v4 }
  0x98   : > { %v201_v6 = vmul.f32 1.442695, %v200_v5 }
  0x9a   : > { %359 = vpow2.f32 %v201_v6 }
  0xa4   : > { %v360_v7 = vpop.eup %359 }
  0xa5   : > { %v203_v8 = vadd.f32 1.0, %v360_v7 }
  0xa7   : > { %361 = vrcp.f32 %v203_v8 }
  0xb1   : > { %v362_v9 = vpop.eup %361 }
  0xb2   : > { %v206_v10 = vmul.f32 %v362_v9, %v192_v2 }
  0xb4   : > { %207 = vst [vmem:[%s191_s28] sm:$0xff] %v206_v10 }
  0xb5 PF: > { %s12_s13 = sadd.s32 1, %s401_s13   ;;  %s476_s9 = smov %s393_s11 }
  0xb6   : > { %p9_p7 = scmp.ge.s32.totalorder %s12_s13, 8   ;;  %s477_s10 = smov %s397_s12 }
  0xb7   : > { %s478_s11 = smov %s481_s14  ;;  %s479_s12 = smov %s485_s15 }
  0xb8   :  { %11 = sbr.rel (!%p9_p7) target bundleno = 3 (0x3), region = 61 }

</bundles_post_ra>
